<compile_context>
chip_gen: v6e
topology: v6e:2x2x1
jax: 0.10.0
libtpu: 0.0.40
codegen_flags: <defaults>
</compile_context>

<pallas_src>
import functools

import jax
import jax.numpy as jnp
import numpy as np
from jax.experimental import pallas as pl
from jax.experimental.pallas import tpu as pltpu

COMPUTE_DTYPE = jnp.bfloat16   # MXU operand dtype (accumulation is always f32)
LANE = 128                     # TPU lane width: pad hidden feature dims to this
DEFAULT_BATCH_TILE = 4096      # batch rows per grid step (auto-clipped / halved)
VMEM_BUDGET_BYTES = 40 * 2 ** 20   # conservative per-call budget (v7x: 64 MiB)


def _round_up(x, m):
    return (x + m - 1) // m * m


# --------------------------------------------------------------------------
# Kernel
# --------------------------------------------------------------------------
def _fused_mlp_kernel(*refs, num_layers, compute_dtype):
    """refs = (obs, act, w1_obs, w1_act, b1, w2, b2, ..., wL, bL, out).

    Weights/biases are full-array blocks with constant index_maps, so they are
    VMEM-resident across the batch grid.  Activations stay on-chip.
    The output ref is a (tb, 1) block: only the real scalar value per row is
    ever written back to HBM.
    """
    obs_ref, act_ref = refs[0], refs[1]
    out_ref = refs[-1]
    p = refs[2:-1]

    # Layer 0: fused concat ->  x @ W1  ==  obs @ W1[:Dobs] + act @ W1[Dobs:]
    h = jnp.dot(obs_ref[...].astype(compute_dtype), p[0][...],
                preferred_element_type=jnp.float32)
    h = h + jnp.dot(act_ref[...].astype(compute_dtype), p[1][...],
                    preferred_element_type=jnp.float32)
    h = jnp.maximum(h + p[2][...], 0.0)

    # Remaining hidden layers + final Linear (no ReLU on the last one).
    idx = 3
    for li in range(1, num_layers):
        w = p[idx][...]
        b = p[idx + 1][...]
        idx += 2
        h = jnp.dot(h.astype(compute_dtype), w,
                    preferred_element_type=jnp.float32) + b
        if li != num_layers - 1:
            h = jnp.maximum(h, 0.0)

    # Final weight/bias are zero-padded past column 0, and all padded hidden
    # lanes are exactly 0 throughout, so lane 0 of `h` is the true value.
    # Store only that lane: (tb, 1) block -> 4 B/row of HBM write traffic.
    out_ref[...] = h[:, :1].astype(out_ref.dtype)


# --------------------------------------------------------------------------
# Parameter init / prep
# --------------------------------------------------------------------------
def init_dmcnet_params(key, state_shape, action_shape, mlp_layers):
    """Matches PyTorch nn.Linear default init: U(-k, k), k = 1/sqrt(fan_in).
    Weights are stored 'math-layout' (fan_in, fan_out); biases (1, fan_out)."""
    input_dim = int(np.prod(state_shape)) + int(np.prod(action_shape))
    layer_dims = [input_dim] + list(mlp_layers) + [1]
    params = []
    for i in range(len(layer_dims) - 1):
        fan_in, fan_out = layer_dims[i], layer_dims[i + 1]
        key, kw, kb = jax.random.split(key, 3)
        bound = 1.0 / np.sqrt(fan_in)
        w = jax.random.uniform(kw, (fan_in, fan_out), jnp.float32, -bound, bound)
        b = jax.random.uniform(kb, (1, fan_out), jnp.float32, -bound, bound)
        params.append((w, b))
    return params


def prepare_params(params, obs_dim, act_dim, compute_dtype=COMPUTE_DTYPE):
    """Zero-pad feature dims to 128 lanes, split the first weight for the
    fused concat, and cast weights to the MXU compute dtype.  Zero padding of
    both weights and biases guarantees padded lanes carry exactly 0, which the
    kernel relies on when it extracts lane 0 of the final layer."""
    flat = []
    for li, (w, b) in enumerate(params):
        din, dout = w.shape
        dout_pad = _round_up(dout, LANE)
        w = jnp.pad(w, ((0, 0), (0, dout_pad - dout)))
        b = jnp.pad(b, ((0, 0), (0, dout_pad - dout)))
        if li == 0:
            assert din == obs_dim + act_dim
            flat += [w[:obs_dim].astype(compute_dtype),
                     w[obs_dim:].astype(compute_dtype),
                     b.astype(jnp.float32)]
        else:
            din_pad = _round_up(din, LANE)
            w = jnp.pad(w, ((0, din_pad - din), (0, 0)))
            flat += [w.astype(compute_dtype), b.astype(jnp.float32)]
    return flat


# --------------------------------------------------------------------------
# Tile selection
# --------------------------------------------------------------------------
def _choose_batch_tile(B, batch_tile):
    """Pick the batch tile.  Big tiles amortize per-grid-step overhead; when
    the whole batch would fit in one tile but is large, split it so the
    'parallel' axis can shard across v7x's two TensorCores."""
    if B > batch_tile:
        return batch_tile                      # >= 2 grid steps naturally
    if B >= 1024:
        return _round_up(pl.cdiv(B, 2), 8)     # force >= 2 steps (dual-TC)
    return B                                   # small batch: single tile


# --------------------------------------------------------------------------
# Forward pass (fused pallas_call)
# --------------------------------------------------------------------------
def dmcnet_forward(prepped_params, obs, actions, *, num_layers,
                   batch_tile=DEFAULT_BATCH_TILE):
    """Equivalent of DMCNet.forward: flatten, concat, MLP (ReLU between),
    final Linear, flatten -> (B,)."""
    B = obs.shape[0]
    obs_flat = obs.reshape(B, -1).astype(jnp.float32)
    act_flat = actions.reshape(B, -1).astype(jnp.float32)
    d_obs = obs_flat.shape[1]
    d_act = act_flat.shape[1]

    # ---- tile selection + VMEM accounting ---------------------------------
    w_bytes = sum(int(np.prod(p.shape)) * p.dtype.itemsize
                  for p in prepped_params)
    max_w = max(int(p.shape[-1]) for p in prepped_params)
    in_row_bytes = (d_obs + d_act) * 4

    def vmem_need(t):
        return (w_bytes                      # weights: VMEM-resident, 1 copy
                + 2 * t * in_row_bytes       # double-buffered input tiles
                + 2 * t * 1 * 4              # double-buffered (tb, 1) output
                + 3 * t * max_w * 4)         # live f32 activations / temps

    tb = _choose_batch_tile(B, batch_tile)
    while tb < B and tb > 256 and vmem_need(tb) > VMEM_BUDGET_BYTES:
        tb = max(256, (tb // 2 // 8) * 8)

    grid = (pl.cdiv(B, tb),)
    vmem_limit = int(min(48 * 2 ** 20,
                         max(32 * 2 ** 20, 2 * vmem_need(tb))))

    # ---- specs -------------------------------------------------------------
    x_specs = [
        pl.BlockSpec((tb, d_obs), lambda i: (i, 0)),
        pl.BlockSpec((tb, d_act), lambda i: (i, 0)),
    ]
    # Full-array blocks + constant index_map => weights stay resident in VMEM.
    w_specs = [pl.BlockSpec(tuple(p.shape), lambda i: (0, 0))
               for p in prepped_params]
    out_spec = pl.BlockSpec((tb, 1), lambda i: (i, 0))

    # ---- advisory cost estimate -------------------------------------------
    flops = 2 * B * sum(int(p.shape[0]) * int(p.shape[1])
                        for p in prepped_params if int(p.shape[0]) > 1)
    bytes_accessed = B * in_row_bytes + w_bytes + B * 4   # de-padded output

    kernel = functools.partial(_fused_mlp_kernel, num_layers=num_layers,
                               compute_dtype=COMPUTE_DTYPE)

    out = pl.pallas_call(
        kernel,
        out_shape=jax.ShapeDtypeStruct((B, 1), jnp.float32),
        grid=grid,
        in_specs=x_specs + w_specs,
        out_specs=out_spec,
        compiler_params=pltpu.CompilerParams(
            dimension_semantics=("parallel",),
            vmem_limit_bytes=vmem_limit,
        ),
        cost_estimate=pl.CostEstimate(flops=flops, transcendentals=0,
                                      bytes_accessed=bytes_accessed),
    )(obs_flat, act_flat, *prepped_params)

    return out.reshape(-1)                 # (B, 1) -> (B,), trivial reshape


# --------------------------------------------------------------------------
# Plain-JAX references
# --------------------------------------------------------------------------
def dmcnet_forward_ref(params, obs, actions, *, matmul_dtype=jnp.float32):
    B = obs.shape[0]
    x = jnp.concatenate([obs.reshape(B, -1), actions.reshape(B, -1)],
                        axis=1).astype(jnp.float32)
    n = len(params)
    for li, (w, b) in enumerate(params):
        x = jnp.dot(x.astype(matmul_dtype), w.astype(matmul_dtype),
                    preferred_element_type=jnp.float32) + b
        if li != n - 1:
            x = jnp.maximum(x, 0.0)
    return x.reshape(-1)


# --------------------------------------------------------------------------
# Smoke test
# --------------------------------------------------------------------------
if __name__ == "__main__":
    # Small shapes consistent with the module:
    #   state_shape = (4, 16) -> 64 features, action_shape = (8,) -> 8 features
    #   => input_dim = 72; mlp_layers = [32, 32, 32]; batch = 2
    state_shape = (4, 16)
    action_shape = (8,)
    mlp_layers = [32, 32, 32]
    batch = 2

    key = jax.random.PRNGKey(0)
    kp, ko, ka = jax.random.split(key, 3)

    params = init_dmcnet_params(kp, state_shape, action_shape, mlp_layers)
    obs = jax.random.normal(ko, (batch,) + state_shape, jnp.float32)
    actions = jax.random.normal(ka, (batch,) + action_shape, jnp.float32)

    obs_dim = int(np.prod(state_shape))
    act_dim = int(np.prod(action_shape))
    prepped = prepare_params(params, obs_dim, act_dim)

    fwd = jax.jit(functools.partial(dmcnet_forward, num_layers=len(params)))
    values = jax.block_until_ready(fwd(prepped, obs, actions))

    # Reference mirroring the kernel's bf16-operand / f32-accumulate numerics.
    ref_bf16 = dmcnet_forward_ref(params, obs, actions,
                                  matmul_dtype=COMPUTE_DTYPE)
    # Full-f32 reference (the PyTorch module's numerics) -- loose tolerance
    # accounts only for the intentional bf16 operand cast.
    # TODO(synk): bf16 MXU operands are a deliberate accuracy/perf trade vs.
    # the PyTorch f32 module; set COMPUTE_DTYPE=jnp.float32 for exact parity.
    ref_f32 = dmcnet_forward_ref(params, obs, actions,
                                 matmul_dtype=jnp.float32)

    assert values.shape == (batch,)
    np.testing.assert_allclose(np.asarray(values), np.asarray(ref_bf16),
                               rtol=1e-3, atol=1e-3)
    np.testing.assert_allclose(np.asarray(values), np.asarray(ref_f32),
                               rtol=5e-2, atol=5e-2)

    print("KERNEL_OK")
</pallas_src>

<mosaic_0001>
module attributes {stable_mosaic.version = 11 : i64} {
  func.func @_fused_mlp_kernel(%arg0: i32, %arg1: memref<2x64xf32, #tpu.memory_space<vmem>>, %arg2: memref<2x8xf32, #tpu.memory_space<vmem>>, %arg3: memref<64x128xbf16, #tpu.memory_space<vmem>>, %arg4: memref<8x128xbf16, #tpu.memory_space<vmem>>, %arg5: memref<1x128xf32, #tpu.memory_space<vmem>>, %arg6: memref<128x128xbf16, #tpu.memory_space<vmem>>, %arg7: memref<1x128xf32, #tpu.memory_space<vmem>>, %arg8: memref<128x128xbf16, #tpu.memory_space<vmem>>, %arg9: memref<1x128xf32, #tpu.memory_space<vmem>>, %arg10: memref<128x128xbf16, #tpu.memory_space<vmem>>, %arg11: memref<1x128xf32, #tpu.memory_space<vmem>>, %arg12: memref<2x1xf32, #tpu.memory_space<vmem>>) attributes {dimension_semantics = [#tpu.dimension_semantics<parallel>], iteration_bounds = array<i64: 1>, scalar_prefetch = 0 : i64, scratch_operands = 0 : i64, tpu.core_type = #tpu.core_type<tc>, window_params = [{transform_indices = @transform_0, window_bounds = array<i64: 2, 64>}, {transform_indices = @transform_1, window_bounds = array<i64: 2, 8>}, {pipeline_mode = #tpu.pipeline_mode<synchronous>, transform_indices = @transform_2, window_bounds = array<i64: 64, 128>}, {pipeline_mode = #tpu.pipeline_mode<synchronous>, transform_indices = @transform_3, window_bounds = array<i64: 8, 128>}, {pipeline_mode = #tpu.pipeline_mode<synchronous>, transform_indices = @transform_4, window_bounds = array<i64: 1, 128>}, {pipeline_mode = #tpu.pipeline_mode<synchronous>, transform_indices = @transform_5, window_bounds = array<i64: 128, 128>}, {pipeline_mode = #tpu.pipeline_mode<synchronous>, transform_indices = @transform_6, window_bounds = array<i64: 1, 128>}, {pipeline_mode = #tpu.pipeline_mode<synchronous>, transform_indices = @transform_7, window_bounds = array<i64: 128, 128>}, {pipeline_mode = #tpu.pipeline_mode<synchronous>, transform_indices = @transform_8, window_bounds = array<i64: 1, 128>}, {pipeline_mode = #tpu.pipeline_mode<synchronous>, transform_indices = @transform_9, window_bounds = array<i64: 128, 128>}, {pipeline_mode = #tpu.pipeline_mode<synchronous>, transform_indices = @transform_10, window_bounds = array<i64: 1, 128>}, {transform_indices = @transform_11, window_bounds = array<i64: 2, 1>}]} {
    %c0 = arith.constant 0 : index
    %c0_0 = arith.constant 0 : index
    %0 = vector.load %arg1[%c0, %c0_0] : memref<2x64xf32, #tpu.memory_space<vmem>>, vector<2x64xf32>
    %1 = arith.truncf %0 : vector<2x64xf32> to vector<2x64xbf16>
    %c0_1 = arith.constant 0 : index
    %c0_2 = arith.constant 0 : index
    %2 = vector.load %arg3[%c0_1, %c0_2] : memref<64x128xbf16, #tpu.memory_space<vmem>>, vector<64x128xbf16>
    %cst = arith.constant dense<0.000000e+00> : vector<2x128xf32>
    %3 = tpu.matmul %1, %2, %cst {dimension_numbers = #tpu.dot_dimension_numbers<[1], [0], [0], [1], [0, 0, 1, 1], [], []>} : vector<2x64xbf16>, vector<64x128xbf16>, vector<2x128xf32> -> vector<2x128xf32>
    %c0_3 = arith.constant 0 : index
    %c0_4 = arith.constant 0 : index
    %4 = vector.load %arg2[%c0_3, %c0_4] : memref<2x8xf32, #tpu.memory_space<vmem>>, vector<2x8xf32>
    %5 = arith.truncf %4 : vector<2x8xf32> to vector<2x8xbf16>
    %c0_5 = arith.constant 0 : index
    %c0_6 = arith.constant 0 : index
    %6 = vector.load %arg4[%c0_5, %c0_6] : memref<8x128xbf16, #tpu.memory_space<vmem>>, vector<8x128xbf16>
    %cst_7 = arith.constant dense<0.000000e+00> : vector<2x128xf32>
    %7 = tpu.matmul %5, %6, %cst_7 {dimension_numbers = #tpu.dot_dimension_numbers<[1], [0], [0], [1], [0, 0, 1, 1], [], []>} : vector<2x8xbf16>, vector<8x128xbf16>, vector<2x128xf32> -> vector<2x128xf32>
    %8 = arith.addf %3, %7 : vector<2x128xf32>
    %c0_8 = arith.constant 0 : index
    %c0_9 = arith.constant 0 : index
    %9 = vector.load %arg5[%c0_8, %c0_9] : memref<1x128xf32, #tpu.memory_space<vmem>>, vector<1x128xf32>
    %10 = vector.broadcast %9 : vector<1x128xf32> to vector<2x128xf32>
    %11 = arith.addf %8, %10 : vector<2x128xf32>
    %cst_10 = arith.constant 0.000000e+00 : f32
    %12 = vector.broadcast %cst_10 : f32 to vector<2x128xf32>
    %13 = arith.maximumf %11, %12 : vector<2x128xf32>
    %c0_11 = arith.constant 0 : index
    %c0_12 = arith.constant 0 : index
    %14 = vector.load %arg6[%c0_11, %c0_12] : memref<128x128xbf16, #tpu.memory_space<vmem>>, vector<128x128xbf16>
    %c0_13 = arith.constant 0 : index
    %c0_14 = arith.constant 0 : index
    %15 = vector.load %arg7[%c0_13, %c0_14] : memref<1x128xf32, #tpu.memory_space<vmem>>, vector<1x128xf32>
    %16 = arith.truncf %13 : vector<2x128xf32> to vector<2x128xbf16>
    %cst_15 = arith.constant dense<0.000000e+00> : vector<2x128xf32>
    %17 = tpu.matmul %16, %14, %cst_15 {dimension_numbers = #tpu.dot_dimension_numbers<[1], [0], [0], [1], [0, 0, 1, 1], [], []>} : vector<2x128xbf16>, vector<128x128xbf16>, vector<2x128xf32> -> vector<2x128xf32>
    %18 = vector.broadcast %15 : vector<1x128xf32> to vector<2x128xf32>
    %19 = arith.addf %17, %18 : vector<2x128xf32>
    %cst_16 = arith.constant 0.000000e+00 : f32
    %20 = vector.broadcast %cst_16 : f32 to vector<2x128xf32>
    %21 = arith.maximumf %19, %20 : vector<2x128xf32>
    %c0_17 = arith.constant 0 : index
    %c0_18 = arith.constant 0 : index
    %22 = vector.load %arg8[%c0_17, %c0_18] : memref<128x128xbf16, #tpu.memory_space<vmem>>, vector<128x128xbf16>
    %c0_19 = arith.constant 0 : index
    %c0_20 = arith.constant 0 : index
    %23 = vector.load %arg9[%c0_19, %c0_20] : memref<1x128xf32, #tpu.memory_space<vmem>>, vector<1x128xf32>
    %24 = arith.truncf %21 : vector<2x128xf32> to vector<2x128xbf16>
    %cst_21 = arith.constant dense<0.000000e+00> : vector<2x128xf32>
    %25 = tpu.matmul %24, %22, %cst_21 {dimension_numbers = #tpu.dot_dimension_numbers<[1], [0], [0], [1], [0, 0, 1, 1], [], []>} : vector<2x128xbf16>, vector<128x128xbf16>, vector<2x128xf32> -> vector<2x128xf32>
    %26 = vector.broadcast %23 : vector<1x128xf32> to vector<2x128xf32>
    %27 = arith.addf %25, %26 : vector<2x128xf32>
    %cst_22 = arith.constant 0.000000e+00 : f32
    %28 = vector.broadcast %cst_22 : f32 to vector<2x128xf32>
    %29 = arith.maximumf %27, %28 : vector<2x128xf32>
    %c0_23 = arith.constant 0 : index
    %c0_24 = arith.constant 0 : index
    %30 = vector.load %arg10[%c0_23, %c0_24] : memref<128x128xbf16, #tpu.memory_space<vmem>>, vector<128x128xbf16>
    %c0_25 = arith.constant 0 : index
    %c0_26 = arith.constant 0 : index
    %31 = vector.load %arg11[%c0_25, %c0_26] : memref<1x128xf32, #tpu.memory_space<vmem>>, vector<1x128xf32>
    %32 = arith.truncf %29 : vector<2x128xf32> to vector<2x128xbf16>
    %cst_27 = arith.constant dense<0.000000e+00> : vector<2x128xf32>
    %33 = tpu.matmul %32, %30, %cst_27 {dimension_numbers = #tpu.dot_dimension_numbers<[1], [0], [0], [1], [0, 0, 1, 1], [], []>} : vector<2x128xbf16>, vector<128x128xbf16>, vector<2x128xf32> -> vector<2x128xf32>
    %34 = vector.broadcast %31 : vector<1x128xf32> to vector<2x128xf32>
    %35 = arith.addf %33, %34 : vector<2x128xf32>
    %36 = vector.extract_strided_slice %35 {offsets = [0, 0], sizes = [2, 1], strides = [1, 1]} : vector<2x128xf32> to vector<2x1xf32>
    %c0_28 = arith.constant 0 : index
    %c0_29 = arith.constant 0 : index
    %37 = vector.load %arg12[%c0_28, %c0_29] : memref<2x1xf32, #tpu.memory_space<vmem>>, vector<2x1xf32>
    tpu.vector_store %arg12[%c0_28, %c0_29], %36 {strides = array<i32>} : memref<2x1xf32, #tpu.memory_space<vmem>>, vector<2x1xf32>,
    return
  }
  func.func @transform_0(%arg0: i32) -> (i32, i32) {
    %c0_i32 = arith.constant 0 : i32
    %c0_i32_0 = arith.constant 0 : i32
    return %arg0, %c0_i32 : i32, i32
  }
  func.func @transform_1(%arg0: i32) -> (i32, i32) {
    %c0_i32 = arith.constant 0 : i32
    %c0_i32_0 = arith.constant 0 : i32
    return %arg0, %c0_i32 : i32, i32
  }
  func.func @transform_2(%arg0: i32) -> (i32, i32) {
    %c0_i32 = arith.constant 0 : i32
    %c0_i32_0 = arith.constant 0 : i32
    %c0_i32_1 = arith.constant 0 : i32
    return %c0_i32, %c0_i32_0 : i32, i32
  }
  func.func @transform_3(%arg0: i32) -> (i32, i32) {
    %c0_i32 = arith.constant 0 : i32
    %c0_i32_0 = arith.constant 0 : i32
    %c0_i32_1 = arith.constant 0 : i32
    return %c0_i32, %c0_i32_0 : i32, i32
  }
  func.func @transform_4(%arg0: i32) -> (i32, i32) {
    %c0_i32 = arith.constant 0 : i32
    %c0_i32_0 = arith.constant 0 : i32
    %c0_i32_1 = arith.constant 0 : i32
    return %c0_i32, %c0_i32_0 : i32, i32
  }
  func.func @transform_5(%arg0: i32) -> (i32, i32) {
    %c0_i32 = arith.constant 0 : i32
    %c0_i32_0 = arith.constant 0 : i32
    %c0_i32_1 = arith.constant 0 : i32
    return %c0_i32, %c0_i32_0 : i32, i32
  }
  func.func @transform_6(%arg0: i32) -> (i32, i32) {
    %c0_i32 = arith.constant 0 : i32
    %c0_i32_0 = arith.constant 0 : i32
    %c0_i32_1 = arith.constant 0 : i32
    return %c0_i32, %c0_i32_0 : i32, i32
  }
  func.func @transform_7(%arg0: i32) -> (i32, i32) {
    %c0_i32 = arith.constant 0 : i32
    %c0_i32_0 = arith.constant 0 : i32
    %c0_i32_1 = arith.constant 0 : i32
    return %c0_i32, %c0_i32_0 : i32, i32
  }
  func.func @transform_8(%arg0: i32) -> (i32, i32) {
    %c0_i32 = arith.constant 0 : i32
    %c0_i32_0 = arith.constant 0 : i32
    %c0_i32_1 = arith.constant 0 : i32
    return %c0_i32, %c0_i32_0 : i32, i32
  }
  func.func @transform_9(%arg0: i32) -> (i32, i32) {
    %c0_i32 = arith.constant 0 : i32
    %c0_i32_0 = arith.constant 0 : i32
    %c0_i32_1 = arith.constant 0 : i32
    return %c0_i32, %c0_i32_0 : i32, i32
  }
  func.func @transform_10(%arg0: i32) -> (i32, i32) {
    %c0_i32 = arith.constant 0 : i32
    %c0_i32_0 = arith.constant 0 : i32
    %c0_i32_1 = arith.constant 0 : i32
    return %c0_i32, %c0_i32_0 : i32, i32
  }
  func.func @transform_11(%arg0: i32) -> (i32, i32) {
    %c0_i32 = arith.constant 0 : i32
    %c0_i32_0 = arith.constant 0 : i32
    return %arg0, %c0_i32 : i32, i32
  }
}

</mosaic_0001>

<bundles_post_ra>
// kernel: dmcnet_forward.1
= control target key start
LH: loop header
LB: loop body
LE: loop exit
PB: predicated region body
PF: predicated region fallthrough
CT: control target
= control target key end

     0   :  { %16 = vsyncpa [#allocation3], 0  ;;  %s1002_s0 = inlined_call_operand.vmem [shape: f32[2,64], index: 0, kind: input, shape index: {}]   ;;  %s1003_s1 = inlined_call_operand.vmem [shape: f32[2,8], index: 1, kind: input, shape index: {}]   ;;  %s1004_s2 = inlined_call_operand.hbm [shape: bf16[64,128], index: 2, kind: input, shape index: {}]   ;;  %s1005_s3 = inlined_call_operand.vmem [shape: bf16[8,128], index: 3, kind: input, shape index: {}]   ;;  %s1006_s4 = inlined_call_operand.vmem [shape: f32[1,128], index: 4, kind: input, shape index: {}]   ;;  %s1007_s5 = inlined_call_operand.hbm [shape: bf16[128,128], index: 5, kind: input, shape index: {}]   ;;  %s1008_s6 = inlined_call_operand.vmem [shape: f32[1,128], index: 6, kind: input, shape index: {}]   ;;  %s1009_s7 = inlined_call_operand.hbm [shape: bf16[128,128], index: 7, kind: input, shape index: {}]   ;;  %s1010_s8 = inlined_call_operand.vmem [shape: f32[1,128], index: 8, kind: input, shape index: {}]   ;;  %s1011_s9 = inlined_call_operand.hbm [shape: bf16[128,128], index: 9, kind: input, shape index: {}]   ;;  %s1012_s10 = inlined_call_operand.vmem [shape: f32[1,128], index: 10, kind: input, shape index: {}]   ;;  %s1013_s11 = inlined_call_operand.vmem [shape: f32[2,1], index: 11, kind: output, shape index: {}]  }
   0x1   :  { %17 = vsyncpa [#allocation5], 0 }
   0x2   :  { %18 = vsyncpa [#allocation8], 0  ;;  %s847_s17 = smov [#allocation4]   ;;  %s848_s19 = smov [#allocation2]  }
   0x3   :  { %s44_s18 = sshll.u32 %s847_s17, 4  ;;  %s28_s20 = sshll.u32 %s848_s19, 4  ;;  %s45_s18 = int_to_ptr.vmem [resolvable:$true] %s44_s18  ;;  %s29_s20 = int_to_ptr.vmem [resolvable:$true] %s28_s20 }
   0x4   :  { %s769_s21 = scalar_lea.vmem %s45_s18, 1024  ;;  %p774_p1 = scmp.lt.s32.totalorder %s45_s18, %s45_s18 }
   0x5   :  { %p770_p0 = scmp.ne.s32.totalorder %s45_s18, %s769_s21  ;;  %p775_p2 = scmp.lt.s32.totalorder %s769_s21, %s769_s21 }
   0x7   :  { %p776_p3 = por %p775_p2, %p774_p1 }
   0x9   :  { %p777_p4 = pnand %p776_p3, %p770_p0 }
   0xb   :  { %780 = shalt.err (!%p777_p4)
}
   0xc   :  { %s849_s22 = smov 64   ;;  %s850_s23 = smov 4  }
   0xd   :  { %50 = dma.hbm_to_vmem [thread:$0]  %s1007_s5, 1024, %s45_s18, [#allocation5], %s849_s22, %s849_s22, %s850_s23  }
   0xe   :  { %s789_s26 = scalar_lea.vmem %s29_s20, 512  ;;  %p794_p6 = scmp.lt.s32.totalorder %s29_s20, %s29_s20 }
   0xf   :  { %p790_p5 = scmp.ne.s32.totalorder %s29_s20, %s789_s26  ;;  %p795_p7 = scmp.lt.s32.totalorder %s789_s26, %s789_s26 }
  0x11   :  { %p796_p8 = por %p795_p7, %p794_p6 }
  0x13   :  { %p797_p9 = pnand %p796_p8, %p790_p5 }
  0x15   :  { %800 = shalt.err (!%p797_p9)
}
  0x16   :  { %34 = dma.hbm_to_vmem [thread:$0]  %s1004_s2, 512, %s29_s20, [#allocation3], %s849_s22, %s849_s22, %s850_s23  }
  0x17   :  { %s851_s29 = smov [#allocation6]   ;;  %s852_s12 = smov [#allocation7]  }
  0x18   :  { %s58_s30 = sshll.u32 %s851_s29, 4  ;;  %s72_s13 = sshll.u32 %s852_s12, 4  ;;  %s59_s30 = int_to_ptr.vmem [resolvable:$true] %s58_s30  ;;  %s73_s13 = int_to_ptr.vmem [resolvable:$true] %s72_s13 }
  0x19   :  { %s809_s5 = scalar_lea.vmem %s59_s30, 1024  ;;  %p814_p11 = scmp.lt.s32.totalorder %s59_s30, %s59_s30 }
  0x1a   :  { %p810_p10 = scmp.ne.s32.totalorder %s59_s30, %s809_s5  ;;  %p815_p12 = scmp.lt.s32.totalorder %s809_s5, %s809_s5 }
  0x1c   :  { %p816_p13 = por %p815_p12, %p814_p11 }
  0x1e   :  { %p817_p0 = pnand %p816_p13, %p810_p10 }
  0x20   :  { %820 = shalt.err (!%p817_p0)
}
  0x21   :  { %64 = dma.hbm_to_vmem [thread:$0]  %s1009_s7, 1024, %s59_s30, [#allocation5], %s849_s22, %s849_s22, %s850_s23  }
  0x22   :  { %s829_s2 = scalar_lea.vmem %s73_s13, 1024  ;;  %p834_p2 = scmp.lt.s32.totalorder %s73_s13, %s73_s13 }
  0x23   :  { %p830_p1 = scmp.ne.s32.totalorder %s73_s13, %s829_s2  ;;  %p835_p3 = scmp.lt.s32.totalorder %s829_s2, %s829_s2 }
  0x25   :  { %p836_p4 = por %p835_p3, %p834_p2 }
  0x27   :  { %p837_p5 = pnand %p836_p4, %p830_p1 }
  0x29   :  { %840 = shalt.err (!%p837_p5)
}
  0x2a   :  { %78 = dma.hbm_to_vmem [thread:$0]  %s1011_s9, 1024, %s73_s13, [#allocation8], %s849_s22, %s849_s22, %s850_s23  }
  0x2b   :  { %841 = dma.done.wait [#allocation3], 512  }
  0x2c   :  { %842 = vsyncadd [#allocation3], 4294966784 }
  0x2d   :  { %843 = dma.done.wait [#allocation5], 2048  }
  0x2e   :  { %844 = vsyncadd [#allocation5], 4294965248 }
  0x2f   :  { %845 = dma.done.wait [#allocation8], 1024  }
  0x30   :  { %846 = vsyncadd [#allocation8], 4294966272  ;;  %v853_v0 = vmov 0.0   ;;  %vm854_vm0 = vmmov 0   ;;  %vm111_vm1 = vcmask 1043456   ;;  %vm107_vm2 = vcmask 64512  }
  0x31   :  { %647 = vmatprep.subr.bf16.mxu1 %v853_v0  ;;  %649 = vmatprep.mubr.msk.bf16.mxu1 %vm854_vm0, %v853_v0  ;;  %v106_v1 = vld [vmem:[%s1005_s3] sm:$0xf]  ;;  %v733_v5 = vld [vmem:[#allocation2 + $0x18] sm:$0xff]   ;;  %v734_v6 = vld [vmem:[#allocation2 + $0x10] sm:$0xff]   ;;  %vm179_vm3 = vcmask 523264   ;;  %vm570_vm4 = vcmask 1024  }
  0x32   :  { %665 = vmatprep.subr.bf16.mxu0 %v853_v0  ;;  %681 = vmatprep.mubr.msk.bf16.mxu0 %vm854_vm0, %v853_v0  ;;  %v104_v2 = vld [vmem:[%s1003_s1] sm:$0x3]  ;;  %v113_v3 = vsel %vm111_vm1, %v106_v1, 0  ;;  %v737_v7 = vld [vmem:[#allocation4 + $0x38] sm:$0xff]   ;;  %v738_v8 = vld [vmem:[#allocation4 + $0x30] sm:$0xff]  }
  0x33   :  { %v105_v4 = vpack.c.bf16 %v104_v2, %v104_v2  ;;  %648 = vmatpush3.bf16.msra.mxu1 %v113_v3  ;;  %666 = vmatpush3.bf16.msra.mxu0 %v737_v7  ;;  %v735_v9 = vld [vmem:[#allocation2 + $0x8] sm:$0xff]   ;;  %v736_v10 = vld [vmem:[#allocation2] sm:$0xff]   ;;  %v741_v15 = vld [vmem:[#allocation4 + $0x18] sm:$0xff]  }
  0x34   :  { %653 = vmatprep.subr.bf16.mxu1 %v853_v0  ;;  %667 = vmatprep.subr.bf16.mxu0 %v853_v0  ;;  %v94_v11 = vld [vmem:[%s1002_s0] sm:$0x3]  ;;  %v739_v13 = vld [vmem:[#allocation4 + $0x28] sm:$0xff]   ;;  %v742_v16 = vld [vmem:[#allocation4 + $0x10] sm:$0xff]  }
  0x35   :  { %v95_v12 = vpack.c.bf16 %v94_v11, %v94_v11  ;;  %v740_v14 = vld [vmem:[#allocation4 + $0x20] sm:$0xff]   ;;  %v743_v17 = vld [vmem:[#allocation4 + $0x8] sm:$0xff]   ;;  %v745_v19 = vld [vmem:[#allocation6 + $0x38] sm:$0xff]  }
  0x36   :  { %650 = vmatmul.mubr.msk.bf16.vlgmr.msra.gmra.mxu1 %vm107_vm2, %v105_v4  ;;  %v744_v18 = vld [vmem:[#allocation4] sm:$0xff]   ;;  %v746_v20 = vld [vmem:[#allocation6 + $0x30] sm:$0xff]   ;;  %v747_v21 = vld [vmem:[#allocation6 + $0x28] sm:$0xff]  }
  0x37   :  { %654 = vmatpush3.bf16.msra.mxu1 %v733_v5  ;;  %661 = vmatprep.mubr.msk.bf16.mxu1 %vm854_vm0, %v853_v0  ;;  %v748_v22 = vld [vmem:[#allocation6 + $0x20] sm:$0xff]   ;;  %v749_v23 = vld [vmem:[#allocation6 + $0x18] sm:$0xff]   ;;  %v750_v24 = vld [vmem:[#allocation6 + $0x10] sm:$0xff]  }
  0x38   :  { %655 = vmatprep.subr.bf16.mxu1 %v853_v0  ;;  %668 = vmatpush3.bf16.msra.mxu0 %v738_v8  ;;  %v585_v30 = vld [vmem:[%s1006_s4] ss:$0 sm:$0xff]  ;;  %v751_v38 = vld [vmem:[#allocation6 + $0x8] sm:$0xff]   ;;  %v753_v40 = vld [vmem:[#allocation7 + $0x38] sm:$0xff]  }
  0x39   :  { %669 = vmatprep.subr.bf16.mxu0 %v853_v0  ;;  %v752_v39 = vld [vmem:[#allocation6] sm:$0xff]   ;;  %v754_v41 = vld [vmem:[#allocation7 + $0x30] sm:$0xff]   ;;  %v755_v42 = vld [vmem:[#allocation7 + $0x28] sm:$0xff]  }
  0x3a   :  { %v756_v43 = vld [vmem:[#allocation7 + $0x20] sm:$0xff]   ;;  %v757_v44 = vld [vmem:[#allocation7 + $0x18] sm:$0xff]   ;;  %v758_v45 = vld [vmem:[#allocation7 + $0x10] sm:$0xff]  }
  0x3b   :  { %656 = vmatpush3.bf16.msra.mxu1 %v734_v6  ;;  %v586_v46 = vld [vmem:[%s1008_s6] ss:$0 sm:$0xff]  ;;  %v759_v54 = vld [vmem:[#allocation7 + $0x8] sm:$0xff]  }
  0x3c   :  { %657 = vmatprep.subr.bf16.mxu1 %v853_v0  ;;  %670 = vmatpush3.bf16.msra.mxu0 %v739_v13  ;;  %v760_v55 = vld [vmem:[#allocation7] sm:$0xff]  }
  0x3d   :  { %671 = vmatprep.subr.bf16.mxu0 %v853_v0  ;;  %v595_v56 = vld [vmem:[%s1010_s8] ss:$0 sm:$0xff] }
  0x3e   :  { %v604_v1 = vld [vmem:[%s1012_s10] ss:$0 sm:$0xff] }
  0x3f   :  { %658 = vmatpush3.bf16.msra.mxu1 %v735_v9 }
  0x40   :  { %659 = vmatprep.subr.bf16.mxu1 %v853_v0  ;;  %672 = vmatpush3.bf16.msra.mxu0 %v740_v14 }
  0x41   :  { %673 = vmatprep.subr.bf16.mxu0 %v853_v0 }
  0x43   :  { %660 = vmatpush3.bf16.msra.mxu1 %v736_v10 }
  0x44   :  { %685 = vmatprep.subr.bf16.mxu1 %v853_v0  ;;  %674 = vmatpush3.bf16.msra.mxu0 %v741_v15 }
  0x45   :  { %675 = vmatprep.subr.bf16.mxu0 %v853_v0 }
  0x46   :  { %662 = vmatmul.mubr.msk.bf16.vlgmr.msra.gmra.mxu1 %vm179_vm3, %v95_v12 }
  0x47   :  { %701 = vmatprep.mubr.msk.bf16.mxu1 %vm854_vm0, %v853_v0  ;;  %686 = vmatpush3.bf16.msra.mxu1 %v745_v19 }
  0x48   :  { %676 = vmatpush3.bf16.msra.mxu0 %v742_v16  ;;  %687 = vmatprep.subr.bf16.mxu1 %v853_v0 }
  0x49   :  { %677 = vmatprep.subr.bf16.mxu0 %v853_v0 }
  0x4b   :  { %688 = vmatpush3.bf16.msra.mxu1 %v746_v20 }
  0x4c   :  { %678 = vmatpush3.bf16.msra.mxu0 %v743_v17  ;;  %689 = vmatprep.subr.bf16.mxu1 %v853_v0 }
  0x4d   :  { %679 = vmatprep.subr.bf16.mxu0 %v853_v0 }
  0x4f   :  { %690 = vmatpush3.bf16.msra.mxu1 %v747_v21 }
  0x50   :  { %680 = vmatpush3.bf16.msra.mxu0 %v744_v18  ;;  %691 = vmatprep.subr.bf16.mxu1 %v853_v0 }
  0x51   :  { %705 = vmatprep.subr.bf16.mxu0 %v853_v0 }
  0x53   :  { %692 = vmatpush3.bf16.msra.mxu1 %v748_v22 }
  0x54   :  { %693 = vmatprep.subr.bf16.mxu1 %v853_v0 }
  0x57   :  { %694 = vmatpush3.bf16.msra.mxu1 %v749_v23 }
  0x58   :  { %695 = vmatprep.subr.bf16.mxu1 %v853_v0 }
  0x5b   :  { %696 = vmatpush3.bf16.msra.mxu1 %v750_v24 }
  0x5c   :  { %697 = vmatprep.subr.bf16.mxu1 %v853_v0 }
  0x5f   :  { %698 = vmatpush3.bf16.msra.mxu1 %v751_v38 }
  0x60   :  { %699 = vmatprep.subr.bf16.mxu1 %v853_v0 }
  0x63   :  { %700 = vmatpush3.bf16.msra.mxu1 %v752_v39 }
  0xf6   :  { %v149_v25 = vpop.f32.mrf.mxu1 }
  0xf8   :  { %v651_v26 = vpop.f32.mrf.mxu1 }
  0xfa   :  { %v152_v27 = vpop.f32.mrf.mxu1 }
  0xfc   :  { %v652_v28 = vpop.f32.mrf.mxu1 }
 0x106   :  { %v217_v29 = vpop.f32.mrf.mxu1 }
 0x107   :  { %v218_v31 = vadd.f32 %v217_v29, %v149_v25 }
 0x108   :  { %v663_v32 = vpop.f32.mrf.mxu1 }
 0x109   :  { %v230_v33 = vadd.f32 %v585_v30, %v218_v31 }
 0x10a   :  { %v220_v34 = vpop.f32.mrf.mxu1 }
 0x10b   :  { %v231_v35 = vmax.f32 %v230_v33, 0.0 }
 0x10c   :  { %v664_v36 = vpop.f32.mrf.mxu1 }
 0x10d   :  { %v249_v37 = vpack.c.bf16 %v231_v35, %v231_v35 }
 0x10f   :  { %682 = vmatmul.mubr.bf16.vlgmr.msra.gmra.mxu0 %v249_v37 }
 0x110   :  { %721 = vmatprep.mubr.msk.bf16.mxu0 %vm854_vm0, %v853_v0  ;;  %706 = vmatpush3.bf16.msra.mxu0 %v753_v40 }
 0x111   :  { %707 = vmatprep.subr.bf16.mxu0 %v853_v0 }
 0x114   :  { %708 = vmatpush3.bf16.msra.mxu0 %v754_v41 }
 0x115   :  { %709 = vmatprep.subr.bf16.mxu0 %v853_v0 }
 0x118   :  { %710 = vmatpush3.bf16.msra.mxu0 %v755_v42 }
 0x119   :  { %711 = vmatprep.subr.bf16.mxu0 %v853_v0 }
 0x11c   :  { %712 = vmatpush3.bf16.msra.mxu0 %v756_v43 }
 0x11d   :  { %713 = vmatprep.subr.bf16.mxu0 %v853_v0 }
 0x120   :  { %714 = vmatpush3.bf16.msra.mxu0 %v757_v44 }
 0x121   :  { %715 = vmatprep.subr.bf16.mxu0 %v853_v0 }
 0x124   :  { %716 = vmatpush3.bf16.msra.mxu0 %v758_v45 }
 0x125   :  { %717 = vmatprep.subr.bf16.mxu0 %v853_v0 }
 0x128   :  { %718 = vmatpush3.bf16.msra.mxu0 %v759_v54 }
 0x129   :  { %719 = vmatprep.subr.bf16.mxu0 %v853_v0 }
 0x12c   :  { %720 = vmatpush3.bf16.msra.mxu0 %v760_v55 }
 0x1cf   :  { %v338_v47 = vpop.f32.mrf.mxu0 }
 0x1d0   :  { %v339_v48 = vadd.f32 %v586_v46, %v338_v47 }
 0x1d1   :  { %v683_v49 = vpop.f32.mrf.mxu0 }
 0x1d2   :  { %v344_v50 = vmax.f32 %v339_v48, 0.0 }
 0x1d3   :  { %v341_v51 = vpop.f32.mrf.mxu0 }
 0x1d4   :  { %v362_v52 = vpack.c.bf16 %v344_v50, %v344_v50 }
 0x1d5   :  { %v684_v53 = vpop.f32.mrf.mxu0 }
 0x1d6   :  { %702 = vmatmul.mubr.bf16.vlgmr.msra.gmra.mxu1 %v362_v52 }
 0x296   :  { %v451_v57 = vpop.f32.mrf.mxu1 }
 0x297   :  { %v452_v58 = vadd.f32 %v595_v56, %v451_v57 }
 0x298   :  { %v703_v59 = vpop.f32.mrf.mxu1 }
 0x299   :  { %v457_v60 = vmax.f32 %v452_v58, 0.0 }
 0x29a   :  { %v454_v61 = vpop.f32.mrf.mxu1 }
 0x29b   :  { %v475_v62 = vpack.c.bf16 %v457_v60, %v457_v60 }
 0x29c   :  { %v704_v63 = vpop.f32.mrf.mxu1 }
 0x29d   :  { %722 = vmatmul.mubr.bf16.vlgmr.msra.gmra.mxu0 %v475_v62 }
 0x35d   :  { %v564_v2 = vpop.f32.mrf.mxu0 }
 0x35e   :  { %v565_v0 = vadd.f32 %v604_v1, %v564_v2 }
 0x35f   :  { %v723_v3 = vpop.f32.mrf.mxu0 }
 0x360   :  { %571 = vst.msk [vmem:[%s1013_s11] sm:$0x3] %vm570_vm4, %v565_v0 }
 0x361   :  { %v567_v4 = vpop.f32.mrf.mxu0 }
 0x363   :  { %v724_v5 = vpop.f32.mrf.mxu0 }
 0x364   :  { %576 = vsyncpa [#allocation3], 1 }
 0x365   :  { %577 = vsyncpa [#allocation5], 1 }
 0x366   :  { %578 = vsyncpa [#allocation8], 1 }

</bundles_post_ra>
